<compile_context>
chip_gen: v5e
topology: v5e:2x2
jax: 0.10.0
libtpu: 0.0.40
codegen_flags: <defaults>
</compile_context>

<pallas_src>
import jax
import jax.numpy as jnp
from jax.experimental import pallas as pl
from jax.experimental.pallas import tpu as pltpu


def _apply_gate_kernel(gate_ref, res_ref, f_ref, out_ref):
    # gate_ref: (TILE_R, 1) per-(batch*channel) scalar gate
    # res_ref / f_ref / out_ref: (TILE_R, TILE_HW)
    out_ref[...] = gate_ref[...] * f_ref[...] + res_ref[...]


def _round_up(x, m):
    return ((x + m - 1) // m) * m


def _choose_tiles(R, HW, itemsize, budget_bytes=8 * 1024 * 1024):
    """Pick (tile_r, tile_hw) so 3 streams x 2 pipeline buffers fit the VMEM budget."""
    hw128 = _round_up(HW, 128)
    # Row tile: full rows when tiny (block dim may equal the full array dim),
    # otherwise a multiple of 8 (sublane granularity).
    tile_r = R if R <= 8 else 8
    per_row = 3 * 2 * tile_r * itemsize
    tile_hw = min(hw128, max(128, (budget_bytes // per_row // 128) * 128))
    if R > 8:
        # Grow the row tile with the remaining budget (keeps the grid-step
        # count low when the spatial extent is small).
        max_r = budget_bytes // (3 * 2 * tile_hw * itemsize)
        tile_r = max(8, min((max_r // 8) * 8, (R // 8) * 8))
    return tile_r, tile_hw


def cwb_forward(res, f, w1, b1, alpha, w2, b2):
    B, C, H, W = res.shape
    HW = H * W
    R = B * C
    dtype = res.dtype

    # --- gate math (global avg pool -> conv1 -> PReLU -> conv2 -> sigmoid) in plain JAX.
    # O(B*C^2): negligible next to the O(B*C*H*W) elementwise traffic below.
    pooled = jnp.concatenate(
        [jnp.mean(res, axis=(2, 3)), jnp.mean(f, axis=(2, 3))], axis=1
    ).astype(jnp.float32)                               # (B, 2C), cat order (res, f)
    y = pooled @ w1.T + b1[:, 0]                        # conv1 (1x1) == channel matmul
    a = alpha.reshape(())                               # single shared PReLU parameter
    y = jnp.where(y > 0, y, a * y)                      # PReLU
    y = y @ w2.T + b2[:, 0]                             # conv2 (1x1)
    gate = jax.nn.sigmoid(y).astype(dtype).reshape(R, 1)  # (B*C, 1)

    # --- elementwise apply in Pallas: out = gate * f + res, flattened 2D layout.
    res2 = res.reshape(R, HW)   # free (contiguous) reshapes, no copies
    f2 = f.reshape(R, HW)

    tile_r, tile_hw = _choose_tiles(R, HW, jnp.dtype(dtype).itemsize)
    grid = (pl.cdiv(R, tile_r), pl.cdiv(HW, tile_hw))

    out = pl.pallas_call(
        _apply_gate_kernel,
        out_shape=jax.ShapeDtypeStruct((R, HW), dtype),
        grid_spec=pltpu.PrefetchScalarGridSpec(
            num_scalar_prefetch=0,
            grid=grid,
            in_specs=[
                pl.BlockSpec((tile_r, 1), lambda r, s: (r, 0)),        # gate
                pl.BlockSpec((tile_r, tile_hw), lambda r, s: (r, s)),  # res
                pl.BlockSpec((tile_r, tile_hw), lambda r, s: (r, s)),  # f
            ],
            out_specs=pl.BlockSpec((tile_r, tile_hw), lambda r, s: (r, s)),
        ),
        compiler_params=pltpu.CompilerParams(
            dimension_semantics=("parallel", "parallel"),
        ),
    )(gate, res2, f2)

    return out.reshape(B, C, H, W)


cwb_forward_jit = jax.jit(cwb_forward)


def cwb_reference(res, f, w1, b1, alpha, w2, b2):
    # pure-JAX reference, same math as the PyTorch module
    pooled = jnp.concatenate(
        [jnp.mean(res, axis=(2, 3)), jnp.mean(f, axis=(2, 3))], axis=1
    )                                                   # (B, 2C)
    y = pooled @ w1.T + b1[:, 0]                        # (B, C)
    a = alpha.reshape(())
    y = jnp.where(y > 0, y, a * y)
    y = y @ w2.T + b2[:, 0]                             # (B, C)
    gate = jax.nn.sigmoid(y)[:, :, None, None]          # (B, C, 1, 1)
    return gate * f + res


if __name__ == "__main__":
    B, C, H, W = 2, 4, 16, 16            # in_ch = 2*C = 8, out_ch = C = 4
    in_ch, out_ch = 2 * C, C

    key = jax.random.PRNGKey(0)
    k_res, k_f, k_w1, k_b1, k_w2, k_b2 = jax.random.split(key, 6)

    res = jax.random.normal(k_res, (B, C, H, W), dtype=jnp.float32)
    f = jax.random.normal(k_f, (B, C, H, W), dtype=jnp.float32)

    # deterministic synthetic parameters (shapes from nn.Conv2d / nn.PReLU)
    w1 = jax.random.normal(k_w1, (out_ch, in_ch), dtype=jnp.float32) * 0.1   # conv1 1x1 weight
    b1 = jax.random.normal(k_b1, (out_ch, 1), dtype=jnp.float32) * 0.1       # conv1 bias
    alpha = jnp.full((1,), 0.25, dtype=jnp.float32)                          # PReLU default init
    w2 = jax.random.normal(k_w2, (out_ch, out_ch), dtype=jnp.float32) * 0.1  # conv2 1x1 weight
    b2 = jax.random.normal(k_b2, (out_ch, 1), dtype=jnp.float32) * 0.1       # conv2 bias

    out = cwb_forward_jit(res, f, w1, b1, alpha, w2, b2)
    jax.block_until_ready(out)

    ref = cwb_reference(res, f, w1, b1, alpha, w2, b2)
    assert out.shape == (B, C, H, W)
    assert jnp.allclose(out, ref, atol=1e-5, rtol=1e-5), "mismatch vs reference"

    print("KERNEL_OK")
</pallas_src>

<mosaic_0001>
module attributes {stable_mosaic.version = 11 : i64} {
  func.func @_apply_gate_kernel(%arg0: i32, %arg1: i32, %arg2: memref<8x1xf32, #tpu.memory_space<vmem>>, %arg3: memref<8x256xf32, #tpu.memory_space<vmem>>, %arg4: memref<8x256xf32, #tpu.memory_space<vmem>>, %arg5: memref<8x256xf32, #tpu.memory_space<vmem>>) attributes {dimension_semantics = [#tpu.dimension_semantics<parallel>, #tpu.dimension_semantics<parallel>], iteration_bounds = array<i64: 1, 1>, scalar_prefetch = 0 : i64, scratch_operands = 0 : i64, tpu.core_type = #tpu.core_type<tc>, window_params = [{transform_indices = @transform_0, window_bounds = array<i64: 8, 1>}, {transform_indices = @transform_1, window_bounds = array<i64: 8, 256>}, {transform_indices = @transform_2, window_bounds = array<i64: 8, 256>}, {transform_indices = @transform_3, window_bounds = array<i64: 8, 256>}]} {
    %c0 = arith.constant 0 : index
    %c0_0 = arith.constant 0 : index
    %0 = vector.load %arg2[%c0, %c0_0] : memref<8x1xf32, #tpu.memory_space<vmem>>, vector<8x1xf32>
    %c0_1 = arith.constant 0 : index
    %c0_2 = arith.constant 0 : index
    %1 = vector.load %arg4[%c0_1, %c0_2] : memref<8x256xf32, #tpu.memory_space<vmem>>, vector<8x256xf32>
    %2 = vector.broadcast %0 : vector<8x1xf32> to vector<8x256xf32>
    %3 = arith.mulf %2, %1 : vector<8x256xf32>
    %c0_3 = arith.constant 0 : index
    %c0_4 = arith.constant 0 : index
    %4 = vector.load %arg3[%c0_3, %c0_4] : memref<8x256xf32, #tpu.memory_space<vmem>>, vector<8x256xf32>
    %5 = arith.addf %3, %4 : vector<8x256xf32>
    %c0_5 = arith.constant 0 : index
    %c0_6 = arith.constant 0 : index
    %6 = vector.load %arg5[%c0_5, %c0_6] : memref<8x256xf32, #tpu.memory_space<vmem>>, vector<8x256xf32>
    tpu.vector_store %arg5[%c0_5, %c0_6], %5 {strides = array<i32>} : memref<8x256xf32, #tpu.memory_space<vmem>>, vector<8x256xf32>,
    return
  }
  func.func @transform_0(%arg0: i32, %arg1: i32) -> (i32, i32) {
    %c0_i32 = arith.constant 0 : i32
    %c0_i32_0 = arith.constant 0 : i32
    return %arg0, %c0_i32 : i32, i32
  }
  func.func @transform_1(%arg0: i32, %arg1: i32) -> (i32, i32) {
    %c0_i32 = arith.constant 0 : i32
    return %arg0, %arg1 : i32, i32
  }
  func.func @transform_2(%arg0: i32, %arg1: i32) -> (i32, i32) {
    %c0_i32 = arith.constant 0 : i32
    return %arg0, %arg1 : i32, i32
  }
  func.func @transform_3(%arg0: i32, %arg1: i32) -> (i32, i32) {
    %c0_i32 = arith.constant 0 : i32
    return %arg0, %arg1 : i32, i32
  }
}

</mosaic_0001>

<bundles_post_ra>
// kernel: cwb_forward.1
= control target key start
LH: loop header
LB: loop body
LE: loop exit
PB: predicated region body
PF: predicated region fallthrough
CT: control target
= control target key end

     0   :  { %v36_v0 = vmov 0   ;;  %s78_s0 = inlined_call_operand.vmem [shape: f32[8,1], index: 0, kind: input, shape index: {}]   ;;  %s79_s2 = inlined_call_operand.vmem [shape: f32[8,256], index: 2, kind: input, shape index: {}]   ;;  %s80_s1 = inlined_call_operand.vmem [shape: f32[8,256], index: 1, kind: input, shape index: {}]   ;;  %s81_s3 = inlined_call_operand.vmem [shape: f32[8,256], index: 3, kind: output, shape index: {}]  }
   0x1   :  { %35 = vset.pattern.permute.xlu0 %v36_v0  ;;  %v14_v1 = vld [vmem:[%s78_s0] sm:$0xff]  ;;  %v16_v3 = vld [vmem:[%s79_s2 + $0x8] sm:$0xff] }
   0x2   :  { %19 = vperm.xlu0 %35, %v14_v1   ;;  %v15_v2 = vld [vmem:[%s79_s2] sm:$0xff]  ;;  %v25_v5 = vld [vmem:[%s80_s1 + $0x8] sm:$0xff] }
   0x3   :  { %v24_v4 = vld [vmem:[%s80_s1] sm:$0xff] }
  0x74   :  { %v20_v6 = vpop.permute.xlu0 %19 }
  0x75   :  { %v22_v7 = vmul.f32 %v20_v6, %v15_v2  ;;  %v23_v8 = vmul.f32 %v20_v6, %v16_v3 }
  0x77   :  { %v26_v9 = vadd.f32 %v24_v4, %v22_v7  ;;  %v27_v10 = vadd.f32 %v25_v5, %v23_v8 }
  0x79   :  { %28 = vst [vmem:[%s81_s3] sm:$0xff] %v26_v9 }
  0x7a   :  { %29 = vst [vmem:[%s81_s3 + $0x8] sm:$0xff] %v27_v10 }

</bundles_post_ra>
